<compile_context>
chip_gen: v7x
topology: tpu7x:2x2x1
jax: 0.10.0
libtpu: 0.0.40
codegen_flags: <defaults>
</compile_context>

<pallas_src>
import functools

import jax
import jax.numpy as jnp
from jax.experimental import pallas as pl
from jax.experimental.pallas import tpu as pltpu


# ----------------------------- Pallas kernels ------------------------------

def _rowsum_kernel(x_ref, sum_ref):
    """Tiled spatial sum. Output block is resident across the reduction axis.

    x_ref   : [bc_tile, hw_tile]
    sum_ref : [bc_tile, 1]   (accumulator, same block for all spatial steps)
    """
    @pl.when(pl.program_id(1) == 0)
    def _():
        sum_ref[...] = jnp.zeros_like(sum_ref)

    sum_ref[...] += jnp.sum(x_ref[...], axis=-1, keepdims=True)


def _apply_kernel(k, x_ref, a_ref, b_ref, o_ref):
    """Elementwise hot path: out = max_j (x * a_j + b_j).

    x_ref : [bc_tile, hw_tile]
    a_ref : [bc_tile, k]   (slopes, resident across the spatial axis)
    b_ref : [bc_tile, k]   (intercepts)
    o_ref : [bc_tile, hw_tile]
    """
    x = x_ref[...]
    out = x * a_ref[:, 0:1] + b_ref[:, 0:1]
    for j in range(1, k):
        out = jnp.maximum(out, x * a_ref[:, j:j + 1] + b_ref[:, j:j + 1])
    o_ref[...] = out


# ------------------------------ tiling helpers ------------------------------

def _round_up(x, m):
    return ((x + m - 1) // m) * m


def _largest_aligned_divisor(n, base, cap):
    """Largest d with: d divides n, d % base == 0, d <= cap. n % base == 0."""
    m = n // base
    best = 1
    for q in range(1, m + 1):
        if m % q == 0 and base * q <= cap:
            best = q
    return base * best


# ------------------------------ wrapper (glue) ------------------------------

def init_params(key, channels, reduction=4, k=2):
    """Deterministic synthetic parameters (same shapes as nn.Linear in DyReLUB)."""
    cr = channels // reduction
    k1, k2, k3, k4 = jax.random.split(key, 4)
    return dict(
        w1=jax.random.normal(k1, (cr, channels), jnp.float32) * 0.1,          # fc1.weight
        b1=jax.random.normal(k2, (cr,), jnp.float32) * 0.1,                   # fc1.bias
        w2=jax.random.normal(k3, (2 * k * channels, cr), jnp.float32) * 0.1,  # fc2.weight
        b2=jax.random.normal(k4, (2 * k * channels,), jnp.float32) * 0.1,     # fc2.bias
    )


def dyrelu_b(x, params, k=2, lane_cap=2048, row_cap=256):
    """DyReLUB forward (conv_type='2d'). x: [B, C, H, W] float32 -> [B, C, H, W]."""
    B, C, H, W = x.shape
    BC, HW = B * C, H * W

    x_flat = x.reshape(BC, HW).astype(jnp.float32)

    # Pad to (8, 128)-aligned shapes so every block/store is full and unmasked.
    BC_pad = _round_up(BC, 8)
    HW_pad = _round_up(HW, 128)
    if (BC_pad, HW_pad) != (BC, HW):
        x_flat = jnp.pad(x_flat, ((0, BC_pad - BC), (0, HW_pad - HW)))

    # Largest aligned tiles within a conservative, cross-generation VMEM budget
    # (256 x 2048 x f32 = 2 MiB/block; x + out double-buffered ~= 8 MiB total).
    bc_tile = _largest_aligned_divisor(BC_pad, 8, row_cap)
    hw_tile = _largest_aligned_divisor(HW_pad, 128, lane_cap)
    grid = (BC_pad // bc_tile, HW_pad // hw_tile)

    cparams_reduce = pltpu.CompilerParams(
        dimension_semantics=("parallel", "arbitrary"),   # reduction axis last
        vmem_limit_bytes=32 * 1024 * 1024)
    cparams_apply = pltpu.CompilerParams(
        dimension_semantics=("parallel", "parallel"),    # both TCs on v7x
        vmem_limit_bytes=32 * 1024 * 1024)

    # ---- Pallas pass 1: tiled spatial sum -> theta --------------------------
    row_sum = pl.pallas_call(
        _rowsum_kernel,
        out_shape=jax.ShapeDtypeStruct((BC_pad, 1), jnp.float32),
        grid=grid,
        in_specs=[pl.BlockSpec((bc_tile, hw_tile), lambda i, j: (i, j))],
        out_specs=pl.BlockSpec((bc_tile, 1), lambda i, j: (i, 0)),
        compiler_params=cparams_reduce,
    )(x_flat)

    # Zero padding contributes 0 to the sum; divide by the true spatial size.
    theta = row_sum[:BC, 0].reshape(B, C) / float(HW)                 # [B, C]

    # ---- tiny MLP + sigmoid in plain JAX (O(B*C*Cr), negligible) ------------
    h = jnp.maximum(theta @ params["w1"].T + params["b1"], 0.0)       # [B, Cr]
    t = h @ params["w2"].T + params["b2"]                             # [B, 2kC]
    t = 2.0 * jax.nn.sigmoid(t) - 1.0

    lambdas = jnp.array([1.0] * k + [0.5] * k, jnp.float32)
    init_v = jnp.array([1.0] + [0.0] * (2 * k - 1), jnp.float32)
    coefs = t.reshape(B, C, 2 * k) * lambdas + init_v                 # [B, C, 2k]

    a = coefs[:, :, :k].reshape(BC, k)                                # slopes
    bb = coefs[:, :, k:].reshape(BC, k)                               # intercepts
    if BC_pad != BC:
        a = jnp.pad(a, ((0, BC_pad - BC), (0, 0)))
        bb = jnp.pad(bb, ((0, BC_pad - BC), (0, 0)))

    # ---- Pallas pass 2: elementwise max over k linear branches --------------
    out_flat = pl.pallas_call(
        functools.partial(_apply_kernel, k),
        out_shape=jax.ShapeDtypeStruct((BC_pad, HW_pad), jnp.float32),
        grid=grid,
        in_specs=[
            pl.BlockSpec((bc_tile, hw_tile), lambda i, j: (i, j)),
            pl.BlockSpec((bc_tile, k), lambda i, j: (i, 0)),   # resident coefs
            pl.BlockSpec((bc_tile, k), lambda i, j: (i, 0)),
        ],
        out_specs=pl.BlockSpec((bc_tile, hw_tile), lambda i, j: (i, j)),
        compiler_params=cparams_apply,
    )(x_flat, a, bb)

    return out_flat[:BC, :HW].reshape(B, C, H, W)


# --------------------------- pure-JAX reference -----------------------------

def dyrelu_b_ref(x, params, k=2):
    B, C, H, W = x.shape
    theta = jnp.mean(jnp.mean(x, axis=-1), axis=-1)                   # [B, C]
    h = jnp.maximum(theta @ params["w1"].T + params["b1"], 0.0)
    t = h @ params["w2"].T + params["b2"]
    t = 2.0 * jax.nn.sigmoid(t) - 1.0
    lambdas = jnp.array([1.0] * k + [0.5] * k, jnp.float32)
    init_v = jnp.array([1.0] + [0.0] * (2 * k - 1), jnp.float32)
    coefs = t.reshape(B, C, 2 * k) * lambdas + init_v                 # [B, C, 2k]
    a = coefs[:, :, :k][:, :, None, None, :]                          # [B, C, 1, 1, k]
    bb = coefs[:, :, k:][:, :, None, None, :]
    return jnp.max(x[..., None] * a + bb, axis=-1)                    # [B, C, H, W]


# ----------------------------------- main ------------------------------------

if __name__ == "__main__":
    key = jax.random.PRNGKey(0)
    kx, kp = jax.random.split(key)

    B, C, H, W = 2, 4, 16, 16
    x = jax.random.normal(kx, (B, C, H, W), jnp.float32)
    params = init_params(kp, channels=C, reduction=4, k=2)

    out = jax.block_until_ready(dyrelu_b(x, params, k=2))

    ref = dyrelu_b_ref(x, params, k=2)
    assert out.shape == (B, C, H, W), out.shape
    max_err = float(jnp.max(jnp.abs(out - ref)))
    assert jnp.allclose(out, ref, rtol=2e-2, atol=2e-2), f"max_err={max_err}"

    print("KERNEL_OK")
</pallas_src>

<mosaic_0001>
module attributes {stable_mosaic.version = 11 : i64} {
  func.func @_rowsum_kernel(%arg0: i32, %arg1: i32, %arg2: memref<8x256xf32, #tpu.memory_space<vmem>>, %arg3: memref<8x1xf32, #tpu.memory_space<vmem>>) attributes {dimension_semantics = [#tpu.dimension_semantics<parallel>, #tpu.dimension_semantics<arbitrary>], iteration_bounds = array<i64: 1, 1>, scalar_prefetch = 0 : i64, scratch_operands = 0 : i64, tpu.core_type = #tpu.core_type<tc>, window_params = [{transform_indices = @transform_0, window_bounds = array<i64: 8, 256>}, {transform_indices = @transform_1, window_bounds = array<i64: 8, 1>}]} {
    %c0_i32 = arith.constant 0 : i32
    %0 = arith.cmpi eq, %arg1, %c0_i32 : i32
    %1 = arith.extui %0 : i1 to i32
    %c0_i32_0 = arith.constant 0 : i32
    %2 = arith.cmpi ne, %1, %c0_i32_0 : i32
    scf.if %2 {
      %cst_6 = arith.constant 0.000000e+00 : f32
      %9 = vector.broadcast %cst_6 : f32 to vector<8x1xf32>
      %c0_7 = arith.constant 0 : index
      %c0_8 = arith.constant 0 : index
      %10 = vector.load %arg3[%c0_7, %c0_8] : memref<8x1xf32, #tpu.memory_space<vmem>>, vector<8x1xf32>
      tpu.vector_store %arg3[%c0_7, %c0_8], %9 {strides = array<i32>} : memref<8x1xf32, #tpu.memory_space<vmem>>, vector<8x1xf32>,
    } else {
    }
    %c0 = arith.constant 0 : index
    %c0_1 = arith.constant 0 : index
    %3 = vector.load %arg3[%c0, %c0_1] : memref<8x1xf32, #tpu.memory_space<vmem>>, vector<8x1xf32>
    %c0_2 = arith.constant 0 : index
    %c0_3 = arith.constant 0 : index
    %4 = vector.load %arg2[%c0_2, %c0_3] : memref<8x256xf32, #tpu.memory_space<vmem>>, vector<8x256xf32>
    %cst = arith.constant dense<0.000000e+00> : vector<8xf32>
    %5 = vector.multi_reduction <add>, %4, %cst [1] : vector<8x256xf32> to vector<8xf32>
    %6 = vector.shape_cast %5 : vector<8xf32> to vector<8x1xf32>
    %7 = arith.addf %3, %6 : vector<8x1xf32>
    %c0_4 = arith.constant 0 : index
    %c0_5 = arith.constant 0 : index
    %8 = vector.load %arg3[%c0_4, %c0_5] : memref<8x1xf32, #tpu.memory_space<vmem>>, vector<8x1xf32>
    tpu.vector_store %arg3[%c0_4, %c0_5], %7 {strides = array<i32>} : memref<8x1xf32, #tpu.memory_space<vmem>>, vector<8x1xf32>,
    return
  }
  func.func @transform_0(%arg0: i32, %arg1: i32) -> (i32, i32) {
    %c0_i32 = arith.constant 0 : i32
    return %arg0, %arg1 : i32, i32
  }
  func.func @transform_1(%arg0: i32, %arg1: i32) -> (i32, i32) {
    %c0_i32 = arith.constant 0 : i32
    %c0_i32_0 = arith.constant 0 : i32
    return %arg0, %c0_i32 : i32, i32
  }
}

</mosaic_0001>

<bundles_post_ra>
// kernel: tpu_custom_call.1
= control target key start
LH: loop header
LB: loop body
LE: loop exit
PB: predicated region body
PF: predicated region fallthrough
CT: control target
= control target key end

     0   :  { %6 = vsyncpa [#allocation3], 0  ;;  %s66_s6 = smov [#allocation2]   ;;  %s99_s0 = inlined_call_operand.hbm [shape: f32[8,256], index: 0, kind: input, shape index: {}]   ;;  %s100_s1 = inlined_call_operand.vmem [shape: f32[8,1], index: 1, kind: output, shape index: {}]  }
   0x1   :  { %s13_s7 = sshll.u32 %s66_s6, 4  ;;  %s42_s10 = scalar_lea.hbm %s99_s0, 256  ;;  %s14_s7 = int_to_ptr.vmem [resolvable:$true] %s13_s7 }
   0x2   :  { %p43_p0 = scmp.ne.s32.totalorder %s99_s0, %s42_s10  ;;  %p46_p1 = scmp.lt.u32.totalorder %s42_s10, %s99_s0 }
   0x4   :  { %p48_p2 = pnand %p46_p1, %p43_p0 }
   0x6   :  { %51 = shalt.err (!%p48_p2)
}
   0x7   :  { %s52_s15 = scalar_lea.vmem %s14_s7, 256  ;;  %p57_p4 = scmp.lt.s32.totalorder %s14_s7, %s14_s7 }
   0x8   :  { %p53_p3 = scmp.ne.s32.totalorder %s14_s7, %s52_s15  ;;  %p58_p5 = scmp.lt.s32.totalorder %s52_s15, %s52_s15 }
   0xa   :  { %p59_p6 = por %p58_p5, %p57_p4 }
   0xc   :  { %p60_p7 = pnand %p59_p6, %p53_p3 }
   0xe   :  { %63 = shalt.err (!%p60_p7)
}
   0xf   :  { %16 = dma.hbm_to_vmem [thread:$0]  %s99_s0, 256, %s14_s7, [#allocation3]  }
  0x10   :  { %64 = dma.done.wait [#allocation3], 256  }
  0x11   :  { %65 = vsyncadd [#allocation3], 4294967040  ;;  %vm24_vm0 = vcmask 7168   ;;  %v67_v0 = vmov 0.0   ;;  %v27_v1 = vld [vmem:[#allocation2] sm:$0xff]  ;;  %v28_v2 = vld [vmem:[#allocation2 + $0x8] sm:$0xff] }
  0x12   :  { %25 = vst.msk [vmem:[%s100_s1] sm:$0xff] %vm24_vm0, %v67_v0  ;;  %v29_v3 = vadd.f32 %v28_v2, %v27_v1 }
  0x14   :  { %30 = vadd.xlane.f32.xlu0 %v29_v3 }
  0x19   :  { %v26_v4 = vld [vmem:[%s100_s1] sm:$0xff] }
  0xa1   :  { %v31_v5 = vpop.xlane.xlu0 %30 }
  0xa2   :  { %v32_v6 = vadd.f32 %v31_v5, %v26_v4 }
  0xa4   :  { %34 = vst.msk [vmem:[%s100_s1] sm:$0xff] %vm24_vm0, %v32_v6 }
  0xa5   :  { %39 = vsyncpa [#allocation3], 1 }

</bundles_post_ra>
